<compile_context>
chip_gen: v6e
topology: v6e:2x2x1
jax: 0.10.0
libtpu: 0.0.40
codegen_flags: <defaults>
</compile_context>

<pallas_src>
from functools import partial

import jax
import jax.numpy as jnp
from jax.experimental import pallas as pl
from jax.experimental.pallas import tpu as pltpu


def mha_kernel(x_ref, y_ref, wq_ref, bq_ref, wkv_ref, bkv_ref, wp_ref, bp_ref,
               out_ref, attn_ref, o_acc_ref, *, num_heads):
    """Processes one batch tile.

    x_ref:     (bt, n, c)     bf16  self input
    y_ref:     (bt, m, d)     bf16  reference input (== x for self-attention)
    wq_ref:    (c, c)         bf16  to_queries weight^T, 1/sqrt(hd) pre-folded
    bq_ref:    (1, c)         f32   to_queries bias,    1/sqrt(hd) pre-folded
    wkv_ref:   (d, 2c)        bf16  to_keys_values weight^T
    bkv_ref:   (1, 2c)        f32
    wp_ref:    (c, c)         bf16  project weight^T
    bp_ref:    (1, c)         f32
    out_ref:   (bt, n, c)     f32   projected output
    attn_ref:  (bt, h, n, m)  bf16  per-head softmax attention (lane-dense m)
    o_acc_ref: (bt*n, c)      bf16  VMEM scratch: concatenated head outputs
    """
    bt, n, c = x_ref.shape
    _, m, d = y_ref.shape
    hd = c // num_heads

    # Fold (batch_tile, seq) into one row dimension so the projection matmuls
    # present bt*n (resp. bt*m) rows to the MXU in a single dot.  NOTE: this
    # reshape is only layout-free when n (resp. m) is a multiple of 8; for
    # other sizes it is still correct but may materialise a VMEM copy.
    x2 = x_ref[...].reshape(bt * n, c)
    y2 = y_ref[...].reshape(bt * m, d)

    # queries = x @ (scale*Wq)^T + scale*bq          -> (bt*n, c)
    # keys_values = y @ Wkv^T + bkv                  -> (bt*m, 2c)
    # torch's reshape(b, m, 2, h, hd): columns [0, c) are keys, [c, 2c) values;
    # head h owns columns [h*hd, (h+1)*hd) within each half.
    # Cast to bf16 once: the MXU consumes bf16 anyway and this halves the two
    # largest live intermediates for the rest of the kernel.
    q = (jnp.dot(x2, wq_ref[...], preferred_element_type=jnp.float32)
         + bq_ref[...]).astype(jnp.bfloat16)
    kv = (jnp.dot(y2, wkv_ref[...], preferred_element_type=jnp.float32)
          + bkv_ref[...]).astype(jnp.bfloat16)

    # TODO(synk): optional `mask` argument of the torch forward is not
    # implemented (default mask=None path only).

    for h in range(num_heads):          # static unroll; num_heads is small
        lo = h * hd
        qh = q[:, lo:lo + hd].reshape(bt, n, hd)
        kh = kv[:, lo:lo + hd].reshape(bt, m, hd)
        vh = kv[:, c + lo:c + lo + hd].reshape(bt, m, hd)

        # attention scores, batched over the batch-tile dim -> (bt, n, m)
        s = jnp.einsum("bnd,bmd->bnm", qh, kh,
                       preferred_element_type=jnp.float32)

        # softmax over m (torch dim=2); EUP approx reciprocal instead of a
        # full-precision VALU divide (rows sum to 1 to approx precision).
        s_max = jnp.max(s, axis=-1, keepdims=True)
        p = jnp.exp(s - s_max)
        p = p * pl.reciprocal(jnp.sum(p, axis=-1, keepdims=True), approx=True)
        pb = p.astype(jnp.bfloat16)

        # lane-dense (m last) bf16 store into the output block; the whole
        # block is written back to HBM in one DMA per grid step.
        attn_ref[:, h, :, :] = pb

        # out_h = attention @ values -> (bt, n, hd); write this head's lane
        # slice of the bf16 VMEM scratch slab (projection input dtype).
        oh = jnp.einsum("bnm,bmd->bnd", pb, vh,
                        preferred_element_type=jnp.float32)
        o_acc_ref[:, lo:lo + hd] = oh.reshape(bt * n, hd).astype(jnp.bfloat16)

    # dropout = 0.0 -> identity.  Final projection over all heads at once
    # (single deep-contraction MXU matmul; scratch is already bf16).
    out2 = (jnp.dot(o_acc_ref[...], wp_ref[...],
                    preferred_element_type=jnp.float32) + bp_ref[...])
    out_ref[...] = out2.reshape(bt, n, c).astype(out_ref.dtype)


def _vmem_capacity_bytes():
    """Physical VMEM per core; conservative fallback = smallest current part."""
    try:
        return int(pltpu.get_tpu_info().vmem_capacity_bytes)
    except Exception:
        return 64 * 1024 * 1024   # v7x per-TensorCore


def _footprint_bytes(bt, n, m, c, d, num_heads):
    """Approximate per-step VMEM footprint for one grid iteration."""
    bf16_b, f32_b = 2, 4
    x_blk = bt * n * c * bf16_b
    y_blk = bt * m * d * bf16_b
    out_blk = bt * n * c * f32_b
    attn_blk = bt * num_heads * n * m * bf16_b
    w_bytes = (c * c + d * 2 * c + c * c) * bf16_b + 4 * c * f32_b
    scratch = bt * n * c * bf16_b                    # bf16 head-output slab
    # Pipelined inputs/outputs are double-buffered; weight blocks use constant
    # index maps but are budgeted twice to stay conservative.
    return 2 * (x_blk + y_blk + out_blk + attn_blk) + 2 * w_bytes + scratch


def _pick_batch_tile(b, n, m, c, d, num_heads, budget):
    best = 1
    for cand in range(1, b + 1):
        if b % cand:
            continue
        # Keep >= 2 grid steps when b > 1 so the "parallel" batch axis can be
        # sharded across both TensorCores on v7x (harmless on 1-TC parts).
        if b > 1 and b // cand < 2:
            continue
        if _footprint_bytes(cand, n, m, c, d, num_heads) <= budget:
            best = cand
    return best


def multi_head_attention(x, params, num_heads, y=None, batch_tile=None,
                         attn_layout="bnmh"):
    """Matches MultiHeadAttention.forward(x, y=None, mask=None).

    Returns (out[b, n, c] fp32, attention bf16).  attention is (b, n, m, h)
    for attn_layout="bnmh" (torch parity; one extra XLA pass over the bf16
    attention tensor) or (b, h, n, m) for attn_layout="bhnm" (lane-dense,
    straight from the kernel — preferred when the consumer can take it).
    """
    y = x if y is None else y
    b, n, c = x.shape
    _, m, d = y.shape
    hd = c // num_heads
    scale = float(hd) ** (-0.5)

    vmem_cap = _vmem_capacity_bytes()
    # Leave headroom for Mosaic internal scratch / code / semaphores.
    vmem_budget = max(16 << 20, min(int(vmem_cap * 0.6), 96 << 20))

    if batch_tile is None:
        batch_tile = _pick_batch_tile(b, n, m, c, d, num_heads, vmem_budget)
    assert b % batch_tile == 0, (b, batch_tile)

    need = _footprint_bytes(batch_tile, n, m, c, d, num_heads)
    vmem_limit = max(32 << 20, need + (8 << 20))
    vmem_limit = min(vmem_limit, int(vmem_cap * 0.9))
    vmem_limit = max(vmem_limit, 16 << 20)

    f32, bf16 = jnp.float32, jnp.bfloat16

    # torch nn.Linear stores (out, in); pre-transpose to (in, out).  Fold the
    # 1/sqrt(head_dim) scale into the query projection.  Weights go to bf16
    # (native MXU inputs; halves the VMEM held by the constant-index weight
    # blocks); biases stay fp32 and are added to fp32 accumulators.
    wq_t = (params["wq"] * scale).T.astype(bf16)          # (c, c)
    bq = (params["bq"] * scale).reshape(1, c).astype(f32)
    wkv_t = params["wkv"].T.astype(bf16)                  # (d, 2c)
    bkv = params["bkv"].reshape(1, 2 * c).astype(f32)
    wp_t = params["wp"].T.astype(bf16)                    # (c, c)
    bp = params["bp"].reshape(1, c).astype(f32)

    xb = x.astype(bf16)
    yb = y.astype(bf16)

    kernel = partial(mha_kernel, num_heads=num_heads)

    out, attn_bhnm = pl.pallas_call(
        kernel,
        out_shape=(
            jax.ShapeDtypeStruct((b, n, c), f32),
            jax.ShapeDtypeStruct((b, num_heads, n, m), bf16),
        ),
        grid_spec=pltpu.PrefetchScalarGridSpec(
            num_scalar_prefetch=0,
            grid=(b // batch_tile,),
            in_specs=[
                pl.BlockSpec((batch_tile, n, c), lambda i: (i, 0, 0)),   # x
                pl.BlockSpec((batch_tile, m, d), lambda i: (i, 0, 0)),   # y
                pl.BlockSpec((c, c), lambda i: (0, 0)),                  # Wq^T * scale
                pl.BlockSpec((1, c), lambda i: (0, 0)),                  # bq * scale
                pl.BlockSpec((d, 2 * c), lambda i: (0, 0)),              # Wkv^T
                pl.BlockSpec((1, 2 * c), lambda i: (0, 0)),              # bkv
                pl.BlockSpec((c, c), lambda i: (0, 0)),                  # Wp^T
                pl.BlockSpec((1, c), lambda i: (0, 0)),                  # bp
            ],
            out_specs=[
                pl.BlockSpec((batch_tile, n, c), lambda i: (i, 0, 0)),
                pl.BlockSpec((batch_tile, num_heads, n, m),
                             lambda i: (i, 0, 0, 0)),
            ],
            scratch_shapes=[pltpu.VMEM((batch_tile * n, c), bf16)],
        ),
        compiler_params=pltpu.CompilerParams(
            dimension_semantics=("parallel",),
            vmem_limit_bytes=int(vmem_limit),
        ),
    )(xb, yb, wq_t, bq, wkv_t, bkv, wp_t, bp)

    if attn_layout == "bhnm":
        return out, attn_bhnm
    # torch layout (b, n, m, h).  NOTE: this is an extra XLA pass over the
    # (now bf16) attention tensor with a lane-sparse last dim (h); prefer
    # attn_layout="bhnm" when the consumer can accept it.
    return out, jnp.transpose(attn_bhnm, (0, 2, 3, 1))


def _reference(x, params, num_heads, y=None):
    """Pure-JAX fp32 reference mirroring the PyTorch forward."""
    y = x if y is None else y
    b, n, c = x.shape
    _, m, d = y.shape
    hd = c // num_heads
    scale = hd ** (-0.5)
    q = (x @ params["wq"].T + params["bq"]).reshape(b, n, num_heads, hd)
    kv = (y @ params["wkv"].T + params["bkv"]).reshape(b, m, 2, num_heads, hd)
    keys, values = kv[:, :, 0], kv[:, :, 1]
    attn = jnp.einsum("bnhd,bmhd->bnmh", q, keys) * scale
    attn = jax.nn.softmax(attn, axis=2)
    out = jnp.einsum("bnmh,bmhd->bnhd", attn, values).reshape(b, n, c)
    out = out @ params["wp"].T + params["bp"]
    return out, attn


if __name__ == "__main__":
    # Small shapes consistent with the module: dim_self = dim_ref = 32, 4 heads.
    B, N, C = 2, 8, 32
    NUM_HEADS = 4
    DIM_REF = C

    key = jax.random.PRNGKey(0)
    k_x, k_wq, k_bq, k_wkv, k_bkv, k_wp, k_bp = jax.random.split(key, 7)

    x = jax.random.normal(k_x, (B, N, C), dtype=jnp.float32)

    params = {
        # torch nn.Linear weight layout: (out_features, in_features)
        "wq":  0.1 * jax.random.normal(k_wq,  (C, C), dtype=jnp.float32),
        "bq":  0.1 * jax.random.normal(k_bq,  (C,),   dtype=jnp.float32),
        "wkv": 0.1 * jax.random.normal(k_wkv, (2 * C, DIM_REF), dtype=jnp.float32),
        "bkv": 0.1 * jax.random.normal(k_bkv, (2 * C,), dtype=jnp.float32),
        "wp":  0.1 * jax.random.normal(k_wp,  (C, C), dtype=jnp.float32),
        "bp":  0.1 * jax.random.normal(k_bp,  (C,),   dtype=jnp.float32),
    }

    # Default path: torch-compatible attention layout (b, n, m, h).
    out, attn = multi_head_attention(x, params, NUM_HEADS)
    out = jax.block_until_ready(out)
    attn = jax.block_until_ready(attn)

    # Fast path: lane-dense attention layout (b, h, n, m), no post-kernel pass.
    out_fast, attn_fast = multi_head_attention(x, params, NUM_HEADS,
                                               attn_layout="bhnm")
    out_fast = jax.block_until_ready(out_fast)
    attn_fast = jax.block_until_ready(attn_fast)

    ref_out, ref_attn = _reference(x, params, NUM_HEADS)

    assert out.shape == (B, N, C), out.shape
    assert attn.shape == (B, N, N, NUM_HEADS), attn.shape
    assert attn_fast.shape == (B, NUM_HEADS, N, N), attn_fast.shape

    # bf16 matmul inputs and bf16 attention output -> loosened tolerances vs.
    # the fp32 reference.
    assert jnp.allclose(out, ref_out, atol=2e-2, rtol=2e-2)
    assert jnp.allclose(attn.astype(jnp.float32), ref_attn, atol=2e-2, rtol=2e-2)
    assert jnp.allclose(out_fast, ref_out, atol=2e-2, rtol=2e-2)
    assert jnp.allclose(attn_fast.astype(jnp.float32),
                        jnp.transpose(ref_attn, (0, 3, 1, 2)),
                        atol=2e-2, rtol=2e-2)

    print("KERNEL_OK")
</pallas_src>

<mosaic_0001>
module attributes {stable_mosaic.version = 11 : i64} {
  func.func @mha_kernel(%arg0: i32, %arg1: memref<1x8x32xbf16, #tpu.memory_space<vmem>>, %arg2: memref<1x8x32xbf16, #tpu.memory_space<vmem>>, %arg3: memref<32x32xbf16, #tpu.memory_space<vmem>>, %arg4: memref<1x32xf32, #tpu.memory_space<vmem>>, %arg5: memref<32x64xbf16, #tpu.memory_space<vmem>>, %arg6: memref<1x64xf32, #tpu.memory_space<vmem>>, %arg7: memref<32x32xbf16, #tpu.memory_space<vmem>>, %arg8: memref<1x32xf32, #tpu.memory_space<vmem>>, %arg9: memref<1x8x32xf32, #tpu.memory_space<vmem>>, %arg10: memref<1x4x8x8xbf16, #tpu.memory_space<vmem>>, %arg11: memref<8x32xbf16, #tpu.memory_space<vmem>>) attributes {dimension_semantics = [#tpu.dimension_semantics<parallel>], iteration_bounds = array<i64: 2>, scalar_prefetch = 0 : i64, scratch_operands = 1 : i64, tpu.core_type = #tpu.core_type<tc>, window_params = [{transform_indices = @transform_0, window_bounds = array<i64: 1, 8, 32>}, {transform_indices = @transform_1, window_bounds = array<i64: 1, 8, 32>}, {pipeline_mode = #tpu.pipeline_mode<synchronous>, transform_indices = @transform_2, window_bounds = array<i64: 32, 32>}, {pipeline_mode = #tpu.pipeline_mode<synchronous>, transform_indices = @transform_3, window_bounds = array<i64: 1, 32>}, {pipeline_mode = #tpu.pipeline_mode<synchronous>, transform_indices = @transform_4, window_bounds = array<i64: 32, 64>}, {pipeline_mode = #tpu.pipeline_mode<synchronous>, transform_indices = @transform_5, window_bounds = array<i64: 1, 64>}, {pipeline_mode = #tpu.pipeline_mode<synchronous>, transform_indices = @transform_6, window_bounds = array<i64: 32, 32>}, {pipeline_mode = #tpu.pipeline_mode<synchronous>, transform_indices = @transform_7, window_bounds = array<i64: 1, 32>}, {transform_indices = @transform_8, window_bounds = array<i64: 1, 8, 32>}, {transform_indices = @transform_9, window_bounds = array<i64: 1, 4, 8, 8>}]} {
    %c0 = arith.constant 0 : index
    %c0_0 = arith.constant 0 : index
    %c0_1 = arith.constant 0 : index
    %0 = vector.load %arg1[%c0, %c0_0, %c0_1] : memref<1x8x32xbf16, #tpu.memory_space<vmem>>, vector<1x8x32xbf16>
    %1 = vector.shape_cast %0 : vector<1x8x32xbf16> to vector<8x32xbf16>
    %c0_2 = arith.constant 0 : index
    %c0_3 = arith.constant 0 : index
    %c0_4 = arith.constant 0 : index
    %2 = vector.load %arg2[%c0_2, %c0_3, %c0_4] : memref<1x8x32xbf16, #tpu.memory_space<vmem>>, vector<1x8x32xbf16>
    %3 = vector.shape_cast %2 : vector<1x8x32xbf16> to vector<8x32xbf16>
    %c0_5 = arith.constant 0 : index
    %c0_6 = arith.constant 0 : index
    %4 = vector.load %arg3[%c0_5, %c0_6] : memref<32x32xbf16, #tpu.memory_space<vmem>>, vector<32x32xbf16>
    %cst = arith.constant dense<0.000000e+00> : vector<8x32xf32>
    %5 = tpu.matmul %1, %4, %cst {dimension_numbers = #tpu.dot_dimension_numbers<[1], [0], [0], [1], [0, 0, 1, 1], [], []>} : vector<8x32xbf16>, vector<32x32xbf16>, vector<8x32xf32> -> vector<8x32xf32>
    %c0_7 = arith.constant 0 : index
    %c0_8 = arith.constant 0 : index
    %6 = vector.load %arg4[%c0_7, %c0_8] : memref<1x32xf32, #tpu.memory_space<vmem>>, vector<1x32xf32>
    %7 = vector.broadcast %6 : vector<1x32xf32> to vector<8x32xf32>
    %8 = arith.addf %5, %7 : vector<8x32xf32>
    %9 = arith.truncf %8 : vector<8x32xf32> to vector<8x32xbf16>
    %c0_9 = arith.constant 0 : index
    %c0_10 = arith.constant 0 : index
    %10 = vector.load %arg5[%c0_9, %c0_10] : memref<32x64xbf16, #tpu.memory_space<vmem>>, vector<32x64xbf16>
    %cst_11 = arith.constant dense<0.000000e+00> : vector<8x64xf32>
    %11 = tpu.matmul %3, %10, %cst_11 {dimension_numbers = #tpu.dot_dimension_numbers<[1], [0], [0], [1], [0, 0, 1, 1], [], []>} : vector<8x32xbf16>, vector<32x64xbf16>, vector<8x64xf32> -> vector<8x64xf32>
    %c0_12 = arith.constant 0 : index
    %c0_13 = arith.constant 0 : index
    %12 = vector.load %arg6[%c0_12, %c0_13] : memref<1x64xf32, #tpu.memory_space<vmem>>, vector<1x64xf32>
    %13 = vector.broadcast %12 : vector<1x64xf32> to vector<8x64xf32>
    %14 = arith.addf %11, %13 : vector<8x64xf32>
    %15 = arith.truncf %14 : vector<8x64xf32> to vector<8x64xbf16>
    %16 = vector.extract_strided_slice %9 {offsets = [0, 0], sizes = [8, 8], strides = [1, 1]} : vector<8x32xbf16> to vector<8x8xbf16>
    %17 = vector.shape_cast %16 : vector<8x8xbf16> to vector<1x8x8xbf16>
    %18 = vector.extract_strided_slice %15 {offsets = [0, 0], sizes = [8, 8], strides = [1, 1]} : vector<8x64xbf16> to vector<8x8xbf16>
    %19 = vector.shape_cast %18 : vector<8x8xbf16> to vector<1x8x8xbf16>
    %20 = vector.extract_strided_slice %15 {offsets = [0, 32], sizes = [8, 8], strides = [1, 1]} : vector<8x64xbf16> to vector<8x8xbf16>
    %21 = vector.shape_cast %20 : vector<8x8xbf16> to vector<1x8x8xbf16>
    "tpu.trace_start"() <{level = 10 : i32, message = "bnd,bmd->bnm"}> : () -> ()
    %cst_14 = arith.constant dense<0.000000e+00> : vector<1x8x8xf32>
    %22 = tpu.matmul %17, %19, %cst_14 {dimension_numbers = #tpu.dot_dimension_numbers<[2], [2], [1], [1], [0, 0, 0, 1, 1, 1], [0], [0]>} : vector<1x8x8xbf16>, vector<1x8x8xbf16>, vector<1x8x8xf32> -> vector<1x8x8xf32>
    "tpu.trace_stop"() : () -> ()
    %cst_15 = arith.constant dense<0xFF800000> : vector<1x8xf32>
    %23 = vector.multi_reduction <maximumf>, %22, %cst_15 [2] : vector<1x8x8xf32> to vector<1x8xf32>
    %24 = vector.shape_cast %23 : vector<1x8xf32> to vector<1x8x1xf32>
    %25 = vector.broadcast %24 : vector<1x8x1xf32> to vector<1x8x8xf32>
    %26 = arith.subf %22, %25 : vector<1x8x8xf32>
    %27 = math.exp %26 : vector<1x8x8xf32>
    %cst_16 = arith.constant dense<0.000000e+00> : vector<1x8xf32>
    %28 = vector.multi_reduction <add>, %27, %cst_16 [2] : vector<1x8x8xf32> to vector<1x8xf32>
    %29 = vector.shape_cast %28 : vector<1x8xf32> to vector<1x8x1xf32>
    %30 = tpu.reciprocal %29 {approx = true} : vector<1x8x1xf32> -> vector<1x8x1xf32>
    %31 = vector.broadcast %30 : vector<1x8x1xf32> to vector<1x8x8xf32>
    %32 = arith.mulf %27, %31 : vector<1x8x8xf32>
    %33 = arith.truncf %32 : vector<1x8x8xf32> to vector<1x8x8xbf16>
    %c0_17 = arith.constant 0 : index
    %c0_18 = arith.constant 0 : index
    %c0_19 = arith.constant 0 : index
    %c0_20 = arith.constant 0 : index
    %34 = vector.load %arg10[%c0_17, %c0_18, %c0_19, %c0_20] : memref<1x4x8x8xbf16, #tpu.memory_space<vmem>>, vector<1x1x8x8xbf16>
    %35 = vector.shape_cast %34 : vector<1x1x8x8xbf16> to vector<1x8x8xbf16>
    %36 = vector.shape_cast %33 : vector<1x8x8xbf16> to vector<1x1x8x8xbf16>
    tpu.vector_store %arg10[%c0_17, %c0_18, %c0_19, %c0_20], %36 {strides = array<i32>} : memref<1x4x8x8xbf16, #tpu.memory_space<vmem>>, vector<1x1x8x8xbf16>,
    "tpu.trace_start"() <{level = 10 : i32, message = "bnm,bmd->bnd"}> : () -> ()
    %cst_21 = arith.constant dense<0.000000e+00> : vector<1x8x8xf32>
    %37 = tpu.matmul %33, %21, %cst_21 {dimension_numbers = #tpu.dot_dimension_numbers<[2], [1], [1], [2], [0, 0, 0, 1, 1, 2], [0], [0]>} : vector<1x8x8xbf16>, vector<1x8x8xbf16>, vector<1x8x8xf32> -> vector<1x8x8xf32>
    "tpu.trace_stop"() : () -> ()
    %38 = vector.shape_cast %37 : vector<1x8x8xf32> to vector<8x8xf32>
    %39 = arith.truncf %38 : vector<8x8xf32> to vector<8x8xbf16>
    %c0_22 = arith.constant 0 : index
    %c0_23 = arith.constant 0 : index
    %40 = vector.load %arg11[%c0_22, %c0_23] : memref<8x32xbf16, #tpu.memory_space<vmem>>, vector<8x8xbf16>
    tpu.vector_store %arg11[%c0_22, %c0_23], %39 {strides = array<i32>} : memref<8x32xbf16, #tpu.memory_space<vmem>>, vector<8x8xbf16>,
    %41 = vector.extract_strided_slice %9 {offsets = [0, 8], sizes = [8, 8], strides = [1, 1]} : vector<8x32xbf16> to vector<8x8xbf16>
    %42 = vector.shape_cast %41 : vector<8x8xbf16> to vector<1x8x8xbf16>
    %43 = vector.extract_strided_slice %15 {offsets = [0, 8], sizes = [8, 8], strides = [1, 1]} : vector<8x64xbf16> to vector<8x8xbf16>
    %44 = vector.shape_cast %43 : vector<8x8xbf16> to vector<1x8x8xbf16>
    %45 = vector.extract_strided_slice %15 {offsets = [0, 40], sizes = [8, 8], strides = [1, 1]} : vector<8x64xbf16> to vector<8x8xbf16>
    %46 = vector.shape_cast %45 : vector<8x8xbf16> to vector<1x8x8xbf16>
    "tpu.trace_start"() <{level = 10 : i32, message = "bnd,bmd->bnm"}> : () -> ()
    %cst_24 = arith.constant dense<0.000000e+00> : vector<1x8x8xf32>
    %47 = tpu.matmul %42, %44, %cst_24 {dimension_numbers = #tpu.dot_dimension_numbers<[2], [2], [1], [1], [0, 0, 0, 1, 1, 1], [0], [0]>} : vector<1x8x8xbf16>, vector<1x8x8xbf16>, vector<1x8x8xf32> -> vector<1x8x8xf32>
    "tpu.trace_stop"() : () -> ()
    %cst_25 = arith.constant dense<0xFF800000> : vector<1x8xf32>
    %48 = vector.multi_reduction <maximumf>, %47, %cst_25 [2] : vector<1x8x8xf32> to vector<1x8xf32>
    %49 = vector.shape_cast %48 : vector<1x8xf32> to vector<1x8x1xf32>
    %50 = vector.broadcast %49 : vector<1x8x1xf32> to vector<1x8x8xf32>
    %51 = arith.subf %47, %50 : vector<1x8x8xf32>
    %52 = math.exp %51 : vector<1x8x8xf32>
    %cst_26 = arith.constant dense<0.000000e+00> : vector<1x8xf32>
    %53 = vector.multi_reduction <add>, %52, %cst_26 [2] : vector<1x8x8xf32> to vector<1x8xf32>
    %54 = vector.shape_cast %53 : vector<1x8xf32> to vector<1x8x1xf32>
    %55 = tpu.reciprocal %54 {approx = true} : vector<1x8x1xf32> -> vector<1x8x1xf32>
    %56 = vector.broadcast %55 : vector<1x8x1xf32> to vector<1x8x8xf32>
    %57 = arith.mulf %52, %56 : vector<1x8x8xf32>
    %58 = arith.truncf %57 : vector<1x8x8xf32> to vector<1x8x8xbf16>
    %c0_27 = arith.constant 0 : index
    %c1 = arith.constant 1 : index
    %c0_28 = arith.constant 0 : index
    %c0_29 = arith.constant 0 : index
    %59 = vector.load %arg10[%c0_27, %c1, %c0_28, %c0_29] : memref<1x4x8x8xbf16, #tpu.memory_space<vmem>>, vector<1x1x8x8xbf16>
    %60 = vector.shape_cast %59 : vector<1x1x8x8xbf16> to vector<1x8x8xbf16>
    %61 = vector.shape_cast %58 : vector<1x8x8xbf16> to vector<1x1x8x8xbf16>
    tpu.vector_store %arg10[%c0_27, %c1, %c0_28, %c0_29], %61 {strides = array<i32>} : memref<1x4x8x8xbf16, #tpu.memory_space<vmem>>, vector<1x1x8x8xbf16>,
    "tpu.trace_start"() <{level = 10 : i32, message = "bnm,bmd->bnd"}> : () -> ()
    %cst_30 = arith.constant dense<0.000000e+00> : vector<1x8x8xf32>
    %62 = tpu.matmul %58, %46, %cst_30 {dimension_numbers = #tpu.dot_dimension_numbers<[2], [1], [1], [2], [0, 0, 0, 1, 1, 2], [0], [0]>} : vector<1x8x8xbf16>, vector<1x8x8xbf16>, vector<1x8x8xf32> -> vector<1x8x8xf32>
    "tpu.trace_stop"() : () -> ()
    %63 = vector.shape_cast %62 : vector<1x8x8xf32> to vector<8x8xf32>
    %64 = arith.truncf %63 : vector<8x8xf32> to vector<8x8xbf16>
    %c0_31 = arith.constant 0 : index
    %c8 = arith.constant 8 : index
    %65 = vector.load %arg11[%c0_31, %c8] : memref<8x32xbf16, #tpu.memory_space<vmem>>, vector<8x8xbf16>
    tpu.vector_store %arg11[%c0_31, %c8], %64 {strides = array<i32>} : memref<8x32xbf16, #tpu.memory_space<vmem>>, vector<8x8xbf16>,
    %66 = vector.extract_strided_slice %9 {offsets = [0, 16], sizes = [8, 8], strides = [1, 1]} : vector<8x32xbf16> to vector<8x8xbf16>
    %67 = vector.shape_cast %66 : vector<8x8xbf16> to vector<1x8x8xbf16>
    %68 = vector.extract_strided_slice %15 {offsets = [0, 16], sizes = [8, 8], strides = [1, 1]} : vector<8x64xbf16> to vector<8x8xbf16>
    %69 = vector.shape_cast %68 : vector<8x8xbf16> to vector<1x8x8xbf16>
    %70 = vector.extract_strided_slice %15 {offsets = [0, 48], sizes = [8, 8], strides = [1, 1]} : vector<8x64xbf16> to vector<8x8xbf16>
    %71 = vector.shape_cast %70 : vector<8x8xbf16> to vector<1x8x8xbf16>
    "tpu.trace_start"() <{level = 10 : i32, message = "bnd,bmd->bnm"}> : () -> ()
    %cst_32 = arith.constant dense<0.000000e+00> : vector<1x8x8xf32>
    %72 = tpu.matmul %67, %69, %cst_32 {dimension_numbers = #tpu.dot_dimension_numbers<[2], [2], [1], [1], [0, 0, 0, 1, 1, 1], [0], [0]>} : vector<1x8x8xbf16>, vector<1x8x8xbf16>, vector<1x8x8xf32> -> vector<1x8x8xf32>
    "tpu.trace_stop"() : () -> ()
    %cst_33 = arith.constant dense<0xFF800000> : vector<1x8xf32>
    %73 = vector.multi_reduction <maximumf>, %72, %cst_33 [2] : vector<1x8x8xf32> to vector<1x8xf32>
    %74 = vector.shape_cast %73 : vector<1x8xf32> to vector<1x8x1xf32>
    %75 = vector.broadcast %74 : vector<1x8x1xf32> to vector<1x8x8xf32>
    %76 = arith.subf %72, %75 : vector<1x8x8xf32>
    %77 = math.exp %76 : vector<1x8x8xf32>
    %cst_34 = arith.constant dense<0.000000e+00> : vector<1x8xf32>
    %78 = vector.multi_reduction <add>, %77, %cst_34 [2] : vector<1x8x8xf32> to vector<1x8xf32>
    %79 = vector.shape_cast %78 : vector<1x8xf32> to vector<1x8x1xf32>
    %80 = tpu.reciprocal %79 {approx = true} : vector<1x8x1xf32> -> vector<1x8x1xf32>
    %81 = vector.broadcast %80 : vector<1x8x1xf32> to vector<1x8x8xf32>
    %82 = arith.mulf %77, %81 : vector<1x8x8xf32>
    %83 = arith.truncf %82 : vector<1x8x8xf32> to vector<1x8x8xbf16>
    %c0_35 = arith.constant 0 : index
    %c2 = arith.constant 2 : index
    %c0_36 = arith.constant 0 : index
    %c0_37 = arith.constant 0 : index
    %84 = vector.load %arg10[%c0_35, %c2, %c0_36, %c0_37] : memref<1x4x8x8xbf16, #tpu.memory_space<vmem>>, vector<1x1x8x8xbf16>
    %85 = vector.shape_cast %84 : vector<1x1x8x8xbf16> to vector<1x8x8xbf16>
    %86 = vector.shape_cast %83 : vector<1x8x8xbf16> to vector<1x1x8x8xbf16>
    tpu.vector_store %arg10[%c0_35, %c2, %c0_36, %c0_37], %86 {strides = array<i32>} : memref<1x4x8x8xbf16, #tpu.memory_space<vmem>>, vector<1x1x8x8xbf16>,
    "tpu.trace_start"() <{level = 10 : i32, message = "bnm,bmd->bnd"}> : () -> ()
    %cst_38 = arith.constant dense<0.000000e+00> : vector<1x8x8xf32>
    %87 = tpu.matmul %83, %71, %cst_38 {dimension_numbers = #tpu.dot_dimension_numbers<[2], [1], [1], [2], [0, 0, 0, 1, 1, 2], [0], [0]>} : vector<1x8x8xbf16>, vector<1x8x8xbf16>, vector<1x8x8xf32> -> vector<1x8x8xf32>
    "tpu.trace_stop"() : () -> ()
    %88 = vector.shape_cast %87 : vector<1x8x8xf32> to vector<8x8xf32>
    %89 = arith.truncf %88 : vector<8x8xf32> to vector<8x8xbf16>
    %c0_39 = arith.constant 0 : index
    %c16 = arith.constant 16 : index
    %90 = vector.load %arg11[%c0_39, %c16] : memref<8x32xbf16, #tpu.memory_space<vmem>>, vector<8x8xbf16>
    tpu.vector_store %arg11[%c0_39, %c16], %89 {strides = array<i32>} : memref<8x32xbf16, #tpu.memory_space<vmem>>, vector<8x8xbf16>,
    %91 = vector.extract_strided_slice %9 {offsets = [0, 24], sizes = [8, 8], strides = [1, 1]} : vector<8x32xbf16> to vector<8x8xbf16>
    %92 = vector.shape_cast %91 : vector<8x8xbf16> to vector<1x8x8xbf16>
    %93 = vector.extract_strided_slice %15 {offsets = [0, 24], sizes = [8, 8], strides = [1, 1]} : vector<8x64xbf16> to vector<8x8xbf16>
    %94 = vector.shape_cast %93 : vector<8x8xbf16> to vector<1x8x8xbf16>
    %95 = vector.extract_strided_slice %15 {offsets = [0, 56], sizes = [8, 8], strides = [1, 1]} : vector<8x64xbf16> to vector<8x8xbf16>
    %96 = vector.shape_cast %95 : vector<8x8xbf16> to vector<1x8x8xbf16>
    "tpu.trace_start"() <{level = 10 : i32, message = "bnd,bmd->bnm"}> : () -> ()
    %cst_40 = arith.constant dense<0.000000e+00> : vector<1x8x8xf32>
    %97 = tpu.matmul %92, %94, %cst_40 {dimension_numbers = #tpu.dot_dimension_numbers<[2], [2], [1], [1], [0, 0, 0, 1, 1, 1], [0], [0]>} : vector<1x8x8xbf16>, vector<1x8x8xbf16>, vector<1x8x8xf32> -> vector<1x8x8xf32>
    "tpu.trace_stop"() : () -> ()
    %cst_41 = arith.constant dense<0xFF800000> : vector<1x8xf32>
    %98 = vector.multi_reduction <maximumf>, %97, %cst_41 [2] : vector<1x8x8xf32> to vector<1x8xf32>
    %99 = vector.shape_cast %98 : vector<1x8xf32> to vector<1x8x1xf32>
    %100 = vector.broadcast %99 : vector<1x8x1xf32> to vector<1x8x8xf32>
    %101 = arith.subf %97, %100 : vector<1x8x8xf32>
    %102 = math.exp %101 : vector<1x8x8xf32>
    %cst_42 = arith.constant dense<0.000000e+00> : vector<1x8xf32>
    %103 = vector.multi_reduction <add>, %102, %cst_42 [2] : vector<1x8x8xf32> to vector<1x8xf32>
    %104 = vector.shape_cast %103 : vector<1x8xf32> to vector<1x8x1xf32>
    %105 = tpu.reciprocal %104 {approx = true} : vector<1x8x1xf32> -> vector<1x8x1xf32>
    %106 = vector.broadcast %105 : vector<1x8x1xf32> to vector<1x8x8xf32>
    %107 = arith.mulf %102, %106 : vector<1x8x8xf32>
    %108 = arith.truncf %107 : vector<1x8x8xf32> to vector<1x8x8xbf16>
    %c0_43 = arith.constant 0 : index
    %c3 = arith.constant 3 : index
    %c0_44 = arith.constant 0 : index
    %c0_45 = arith.constant 0 : index
    %109 = vector.load %arg10[%c0_43, %c3, %c0_44, %c0_45] : memref<1x4x8x8xbf16, #tpu.memory_space<vmem>>, vector<1x1x8x8xbf16>
    %110 = vector.shape_cast %109 : vector<1x1x8x8xbf16> to vector<1x8x8xbf16>
    %111 = vector.shape_cast %108 : vector<1x8x8xbf16> to vector<1x1x8x8xbf16>
    tpu.vector_store %arg10[%c0_43, %c3, %c0_44, %c0_45], %111 {strides = array<i32>} : memref<1x4x8x8xbf16, #tpu.memory_space<vmem>>, vector<1x1x8x8xbf16>,
    "tpu.trace_start"() <{level = 10 : i32, message = "bnm,bmd->bnd"}> : () -> ()
    %cst_46 = arith.constant dense<0.000000e+00> : vector<1x8x8xf32>
    %112 = tpu.matmul %108, %96, %cst_46 {dimension_numbers = #tpu.dot_dimension_numbers<[2], [1], [1], [2], [0, 0, 0, 1, 1, 2], [0], [0]>} : vector<1x8x8xbf16>, vector<1x8x8xbf16>, vector<1x8x8xf32> -> vector<1x8x8xf32>
    "tpu.trace_stop"() : () -> ()
    %113 = vector.shape_cast %112 : vector<1x8x8xf32> to vector<8x8xf32>
    %114 = arith.truncf %113 : vector<8x8xf32> to vector<8x8xbf16>
    %c0_47 = arith.constant 0 : index
    %c24 = arith.constant 24 : index
    %115 = vector.load %arg11[%c0_47, %c24] : memref<8x32xbf16, #tpu.memory_space<vmem>>, vector<8x8xbf16>
    tpu.vector_store %arg11[%c0_47, %c24], %114 {strides = array<i32>} : memref<8x32xbf16, #tpu.memory_space<vmem>>, vector<8x8xbf16>,
    %c0_48 = arith.constant 0 : index
    %c0_49 = arith.constant 0 : index
    %116 = vector.load %arg11[%c0_48, %c0_49] : memref<8x32xbf16, #tpu.memory_space<vmem>>, vector<8x32xbf16>
    %c0_50 = arith.constant 0 : index
    %c0_51 = arith.constant 0 : index
    %117 = vector.load %arg7[%c0_50, %c0_51] : memref<32x32xbf16, #tpu.memory_space<vmem>>, vector<32x32xbf16>
    %cst_52 = arith.constant dense<0.000000e+00> : vector<8x32xf32>
    %118 = tpu.matmul %116, %117, %cst_52 {dimension_numbers = #tpu.dot_dimension_numbers<[1], [0], [0], [1], [0, 0, 1, 1], [], []>} : vector<8x32xbf16>, vector<32x32xbf16>, vector<8x32xf32> -> vector<8x32xf32>
    %c0_53 = arith.constant 0 : index
    %c0_54 = arith.constant 0 : index
    %119 = vector.load %arg8[%c0_53, %c0_54] : memref<1x32xf32, #tpu.memory_space<vmem>>, vector<1x32xf32>
    %120 = vector.broadcast %119 : vector<1x32xf32> to vector<8x32xf32>
    %121 = arith.addf %118, %120 : vector<8x32xf32>
    %122 = vector.shape_cast %121 : vector<8x32xf32> to vector<1x8x32xf32>
    %c0_55 = arith.constant 0 : index
    %c0_56 = arith.constant 0 : index
    %c0_57 = arith.constant 0 : index
    %123 = vector.load %arg9[%c0_55, %c0_56, %c0_57] : memref<1x8x32xf32, #tpu.memory_space<vmem>>, vector<1x8x32xf32>
    tpu.vector_store %arg9[%c0_55, %c0_56, %c0_57], %122 {strides = array<i32>} : memref<1x8x32xf32, #tpu.memory_space<vmem>>, vector<1x8x32xf32>,
    return
  }
  func.func @transform_0(%arg0: i32) -> (i32, i32, i32) {
    %c0_i32 = arith.constant 0 : i32
    %c0_i32_0 = arith.constant 0 : i32
    %c0_i32_1 = arith.constant 0 : i32
    return %arg0, %c0_i32, %c0_i32_0 : i32, i32, i32
  }
  func.func @transform_1(%arg0: i32) -> (i32, i32, i32) {
    %c0_i32 = arith.constant 0 : i32
    %c0_i32_0 = arith.constant 0 : i32
    %c0_i32_1 = arith.constant 0 : i32
    return %arg0, %c0_i32, %c0_i32_0 : i32, i32, i32
  }
  func.func @transform_2(%arg0: i32) -> (i32, i32) {
    %c0_i32 = arith.constant 0 : i32
    %c0_i32_0 = arith.constant 0 : i32
    %c0_i32_1 = arith.constant 0 : i32
    return %c0_i32, %c0_i32_0 : i32, i32
  }
  func.func @transform_3(%arg0: i32) -> (i32, i32) {
    %c0_i32 = arith.constant 0 : i32
    %c0_i32_0 = arith.constant 0 : i32
    %c0_i32_1 = arith.constant 0 : i32
    return %c0_i32, %c0_i32_0 : i32, i32
  }
  func.func @transform_4(%arg0: i32) -> (i32, i32) {
    %c0_i32 = arith.constant 0 : i32
    %c0_i32_0 = arith.constant 0 : i32
    %c0_i32_1 = arith.constant 0 : i32
    return %c0_i32, %c0_i32_0 : i32, i32
  }
  func.func @transform_5(%arg0: i32) -> (i32, i32) {
    %c0_i32 = arith.constant 0 : i32
    %c0_i32_0 = arith.constant 0 : i32
    %c0_i32_1 = arith.constant 0 : i32
    return %c0_i32, %c0_i32_0 : i32, i32
  }
  func.func @transform_6(%arg0: i32) -> (i32, i32) {
    %c0_i32 = arith.constant 0 : i32
    %c0_i32_0 = arith.constant 0 : i32
    %c0_i32_1 = arith.constant 0 : i32
    return %c0_i32, %c0_i32_0 : i32, i32
  }
  func.func @transform_7(%arg0: i32) -> (i32, i32) {
    %c0_i32 = arith.constant 0 : i32
    %c0_i32_0 = arith.constant 0 : i32
    %c0_i32_1 = arith.constant 0 : i32
    return %c0_i32, %c0_i32_0 : i32, i32
  }
  func.func @transform_8(%arg0: i32) -> (i32, i32, i32) {
    %c0_i32 = arith.constant 0 : i32
    %c0_i32_0 = arith.constant 0 : i32
    %c0_i32_1 = arith.constant 0 : i32
    return %arg0, %c0_i32, %c0_i32_0 : i32, i32, i32
  }
  func.func @transform_9(%arg0: i32) -> (i32, i32, i32, i32) {
    %c0_i32 = arith.constant 0 : i32
    %c0_i32_0 = arith.constant 0 : i32
    %c0_i32_1 = arith.constant 0 : i32
    %c0_i32_2 = arith.constant 0 : i32
    return %arg0, %c0_i32, %c0_i32_0, %c0_i32_1 : i32, i32, i32, i32
  }
}

</mosaic_0001>

<bundles_post_ra>
// kernel: tpu_custom_call.1
= control target key start
LH: loop header
LB: loop body
LE: loop exit
PB: predicated region body
PF: predicated region fallthrough
CT: control target
= control target key end

     0   :  { %s2258_s0 = inlined_call_operand.hbm [shape: bf16[2,8,32], index: 0, kind: input, shape index: {}]   ;;  %s2259_s1 = inlined_call_operand.hbm [shape: bf16[2,8,32], index: 1, kind: input, shape index: {}]   ;;  %s2260_s2 = inlined_call_operand.hbm [shape: bf16[32,32], index: 2, kind: input, shape index: {}]   ;;  %s2261_s3 = inlined_call_operand.vmem [shape: f32[1,32], index: 3, kind: input, shape index: {}]   ;;  %s2262_s4 = inlined_call_operand.hbm [shape: bf16[32,64], index: 4, kind: input, shape index: {}]   ;;  %s2263_s5 = inlined_call_operand.vmem [shape: f32[1,64], index: 5, kind: input, shape index: {}]   ;;  %s2264_s6 = inlined_call_operand.hbm [shape: bf16[32,32], index: 6, kind: input, shape index: {}]   ;;  %s2265_s7 = inlined_call_operand.vmem [shape: f32[1,32], index: 7, kind: input, shape index: {}]   ;;  %s2266_s8 = inlined_call_operand.hbm [shape: f32[2,8,32], index: 8, kind: output, shape index: {0}]   ;;  %s2267_s9 = inlined_call_operand.hbm [shape: bf16[2,4,8,8], index: 9, kind: output, shape index: {1}]  }
   0x1   :  { %2275 = sst [smem:[#allocation24_spill]] %s2260_s2 }
   0x2   :  { %2276 = sst [smem:[#allocation25_spill]] %s2262_s4 }
   0x3   :  { %2277 = sst [smem:[#allocation26_spill]] %s2264_s6 }
   0x4   :  { %15 = vsyncpa [#allocation4], 0 }
   0x5   :  { %17 = vsyncpa [#allocation4 + $0x1], 0 }
   0x6   :  { %18 = vsyncpa [#allocation7], 0 }
   0x7   :  { %20 = vsyncpa [#allocation7 + $0x1], 0 }
   0x8   :  { %21 = vsyncpa [#allocation10], 0 }
   0x9   :  { %22 = vsyncpa [#allocation5], 0 }
   0xa   :  { %24 = vsyncpa [#allocation5 + $0x1], 0 }
   0xb   :  { %25 = vsyncpa [#allocation14], 0 }
   0xc   :  { %27 = vsyncpa [#allocation14 + $0x1], 0  ;;  %s1902_s30 = smov 0   ;;  %s1904_s10 = smov 0  }
   0xd   :  { %s1906_s11 = smov 0   ;;  %s1908_s12 = smov 0  }
   0xe LB: > { %2278 = sst [smem:[#allocation21_spill]] %s1823_s11  ;;  %s1923_s13 = sadd.s32 4294967295, %s1827_s12   ;;  %s1827_s12 = sphi %s1908_s12, %s2300_s12   ;;  %s1823_s11 = sphi %s1906_s11, %s2302_s11   ;;  %s1819_s10 = sphi %s1904_s10, %s2304_s10   ;;  %s1815_s30 = sphi %s1902_s30, %s2303_s30  }
   0xf   : > { %s1310_s14 = sadd.s32 4294967294, %s1827_s12   ;;  %p53_p0 = scmp.ne.s32.totalorder %s1819_s10, %s1815_s30 }
  0x10   : > { %p2268_p1 = scmp.eq.s32.totalorder %s1923_s13, 0  ;;  %p235_p3 = scmp.eq.s32.totalorder %s1310_s14, 1 }
  0x11   : > { %p1311_p5 = scmp.ge.s32.totalorder %s1827_s12, 1  ;;  %p268_p7 = scmp.lt.s32.totalorder %s1827_s12, 3 }
  0x12   : > { %p1932_p4 = por %p2268_p1, %p53_p0  ;;  %p1937_p6 = por %p235_p3, %p53_p0 }
  0x13   : > { %p1942_p8 = pnand %p1311_p5, %p268_p7  ;;  %s1829_s18 = smov [#allocation8]  }
  0x14   : > { %s2279_s15 = scalar_select %p1932_p4, 1, 0 }
  0x15   : > { %s2280_s16 = scalar_select %p1937_p6, 1, 0 }
  0x16   : > { %s2281_s17 = scalar_select %p1942_p8, 1, 0 }
  0x17   : > { %s280_s19 = sshll.u32 %s1829_s18, 4  ;;  %p1482_p9 = pneg %p1942_p8  ;;  %s281_s19 = int_to_ptr.vmem [resolvable:$true] %s280_s19 }
  0x18   : > { %s1830_s21 = smov [#allocation9]   ;;  %s1831_s23 = smov [#allocation11]  }
  0x19   : > { %p1951_p11 = pnand %p1482_p9, %p2268_p1  ;;  %s296_s22 = sshll.u32 %s1830_s21, 4  ;;  %s297_s22 = int_to_ptr.vmem [resolvable:$true] %s296_s22 }
  0x1a   : > { %s312_s24 = sshll.u32 %s1831_s23, 4  ;;  %s1598_s25 = scalar_lea.vmem %s281_s19, 256  ;;  %s313_s24 = int_to_ptr.vmem [resolvable:$true] %s312_s24 }
  0x1b   : > { %p1589_p12 = pneg %p1951_p11  ;;  %p1599_p13 = scmp.ne.s32.totalorder %s281_s19, %s1598_s25 }
  0x1c   : > { %p1606_p5 = scmp.lt.s32.totalorder %s281_s19, %s281_s19  ;;  %p1607_p7 = scmp.lt.s32.totalorder %s1598_s25, %s1598_s25 }
  0x1d   : > { %p1601_p0 = pnand %p1599_p13, %p1589_p12 }
  0x1e   : > { %p1608_p9 = por %p1607_p7, %p1606_p5 }
  0x1f   : > { %p1602_p3 = pneg %p1601_p0 }
  0x21   : > { %p1609_p10 = pnand %p1608_p9, %p1602_p3 }
  0x23   : > { %1612 = shalt.err (!%p1609_p10)
}
  0x24   : > { %s1832_s26 = smov 64   ;;  %s1833_s27 = smov 4  }
  0x25   : > { %s2283_s2 = sld [smem:[#allocation24_spill]]  ;;  %s1624_s14 = scalar_lea.vmem %s297_s22, 256 }
  0x26   : > { %p1625_p1 = scmp.ne.s32.totalorder %s297_s22, %s1624_s14  ;;  %p1632_p2 = scmp.lt.s32.totalorder %s297_s22, %s297_s22 }
  0x27   : > { %p1633_p6 = scmp.lt.s32.totalorder %s1624_s14, %s1624_s14 }
  0x28   : > { %p1627_p13 = pnand %p1625_p1, %p1589_p12 }
  0x29   : > { %p1634_p5 = por %p1633_p6, %p1632_p2 }
  0x2a   : > { %p1628_p0 = pneg %p1627_p13 }
  0x2b   : > { %1485 = dma.hbm_to_vmem [thread:$0]  (!%p1951_p11), %s2283_s2, 256, %s281_s19, [#allocation7], %s1832_s26, %s1832_s26, %s1833_s27  }
  0x2c   : > { %p1635_p3 = pnand %p1634_p5, %p1628_p0 }
  0x2e   : > { %1638 = shalt.err (!%p1635_p3)
}
  0x2f   : > { %s2284_s4 = sld [smem:[#allocation25_spill]]  ;;  %s1650_s19 = scalar_lea.vmem %s313_s24, 256 }
  0x30   : > { %p1651_p10 = scmp.ne.s32.totalorder %s313_s24, %s1650_s19  ;;  %p1658_p9 = scmp.lt.s32.totalorder %s313_s24, %s313_s24 }
  0x31   : > { %p1659_p13 = scmp.lt.s32.totalorder %s1650_s19, %s1650_s19 }
  0x32   : > { %p1653_p7 = pnand %p1651_p10, %p1589_p12 }
  0x33   : > { %p1660_p4 = por %p1659_p13, %p1658_p9 }
  0x34   : > { %p1654_p1 = pneg %p1653_p7 }
  0x35   : > { %1488 = dma.hbm_to_vmem [thread:$0]  (!%p1951_p11), %s2284_s4, 256, %s297_s22, [#allocation10], %s1832_s26, %s1832_s26, %s1833_s27  }
  0x36   : > { %p1661_p2 = pnand %p1660_p4, %p1654_p1 }
  0x38   : > { %1664 = shalt.err (!%p1661_p2)
}
  0x39   : > { %s2285_s6 = sld [smem:[#allocation26_spill]]  ;;  %s1982_s22 = sadd.s32 1, %s1827_s12  }
  0x3a   : > { %2286 = sst [smem:[#allocation22_spill]] %s1982_s22  ;;  %s37_s28 = ssub.s32 %s1827_s12, %s1982_s22 }
  0x3b   : > { %s40_s20 = sadd.s32 1, %s1823_s11  ;;  %p38_p4 = scmp.eq.s32.totalorder %s37_s28, 0 }
  0x3c   : > { %p47_p6 = scmp.ne.s32.totalorder %s1823_s11, %s1819_s10  ;;  %p48_p12 = scmp.eq.s32.totalorder %s1827_s12, 0 }
  0x3d   : > { %p1509_p0 = scmp.lt.s32.totalorder %s1827_s12, 2  ;;  %p2288_p3 = scmp.eq.s32.totalorder %s1923_s13, 1 }
  0x3e   : > { %s1992_s29 = scalar_select %p38_p4, %s1823_s11, %s40_s20  }
  0x3f   : > { %1491 = dma.hbm_to_vmem [thread:$0]  (!%p1951_p11), %s2285_s6, 256, %s313_s24, [#allocation10], %s1832_s26, %s1832_s26, %s1833_s27  }
  0x40   : > { %2287 = sst [smem:[#allocation23_spill]] %s1992_s29  ;;  %p49_p5 = por %p48_p12, %p47_p6 }
  0x41   : > { %p1996_p10 = por %p2288_p3, %p47_p6  ;;  %s329_s18 = sand.u32 1, %s1823_s11  }
  0x42   : > { %s1317_s21 = sshll.u32 %s1827_s12, 6  ;;  %s2002_s24 = sshll.u32 %s329_s18, 2 }
  0x43   : > { %s2289_s14 = scalar_select %p1996_p10, 1, 0 }
  0x44   : > { %s2007_s19 = scalar_lea.hbm %s2258_s0, %s1317_s21  ;;  %s333_s23 = scalar_lea.vmem [#allocation3], %s2002_s24 }
  0x45   : > { %s340_s25 = sshll.u32 %s333_s23, 4  ;;  %p2010_p11 = pnand %p1509_p0, %p49_p5  ;;  %s341_s25 = int_to_ptr.vmem [resolvable:$true] %s340_s25 }
  0x46   : > { %s2017_s4 = scalar_lea.hbm %s2259_s1, %s1317_s21  ;;  %s330_s26 = scalar_lea.sflag [#allocation4], %s329_s18 }
  0x47   : > { %s1665_s27 = scalar_lea.hbm %s2007_s19, 64  ;;  %p1667_p1 = pneg %p2010_p11 }
  0x48   : > { %p1666_p7 = scmp.ne.s32.totalorder %s2007_s19, %s1665_s27  ;;  %s1670_s29 = scalar_lea.hbm %s2258_s0, 128 }
  0x49   : > { %p1671_p2 = scmp.lt.s32.totalorder %s2007_s19, %s2258_s0  ;;  %p1672_p4 = scmp.lt.s32.totalorder %s1670_s29, %s1665_s27 }
  0x4a   : > { %p1668_p9 = pnand %p1667_p1, %p1666_p7 }
  0x4b   : > { %p1673_p6 = por %p1672_p4, %p1671_p2 }
  0x4c   : > { %p1669_p13 = pneg %p1668_p9 }
  0x4e   : > { %p1674_p12 = pnand %p1673_p6, %p1669_p13 }
  0x50   : > { %1677 = shalt.err (!%p1674_p12)
}
  0x51   : > { %s1678_s2 = scalar_lea.vmem %s341_s25, 64  ;;  %s1834_s18 = smov [#allocation3]  }
  0x52   : > { %p1679_p0 = scmp.ne.s32.totalorder %s341_s25, %s1678_s2  ;;  %s1683_s21 = sshll.u32 %s1834_s18, 4  ;;  %s1684_s21 = int_to_ptr.vmem [resolvable:$false] %s1683_s21 }
  0x53   : > { %s1685_s6 = scalar_lea.vmem %s1684_s21, 128  ;;  %p1686_p7 = scmp.lt.s32.totalorder %s341_s25, %s1684_s21 }
  0x54   : > { %p1681_p5 = pnand %p1679_p0, %p1667_p1  ;;  %p1687_p9 = scmp.lt.s32.totalorder %s1685_s6, %s1678_s2 }
  0x56   : > { %p1682_p3 = pneg %p1681_p5  ;;  %p1688_p10 = por %p1687_p9, %p1686_p7 }
  0x58   : > { %p1689_p8 = pnand %p1688_p10, %p1682_p3 }
  0x5a   : > { %1692 = shalt.err (!%p1689_p8)
}
  0x5b   : > { %1495 = dma.hbm_to_vmem [thread:$0]  (!%p2010_p11), %s2007_s19, 64, %s341_s25, %s330_s26  }
  0x5c   : > { %s347_s11 = sand.u32 1, %s1827_s12   ;;  %s351_s22 = scalar_lea.vmem [#allocation6], %s2002_s24 }
  0x5d   : > { %s358_s29 = sshll.u32 %s351_s22, 4  ;;  %s348_s20 = scalar_lea.sflag [#allocation7], %s347_s11  ;;  %s359_s29 = int_to_ptr.vmem [resolvable:$true] %s358_s29 }
  0x5e   : > { %s1693_s27 = scalar_lea.hbm %s2017_s4, 64  ;;  %s1698_s18 = scalar_lea.hbm %s2259_s1, 128 }
  0x5f   : > { %p1694_p13 = scmp.ne.s32.totalorder %s2017_s4, %s1693_s27  ;;  %p1699_p2 = scmp.lt.s32.totalorder %s2017_s4, %s2259_s1 }
  0x60   : > { %p1700_p4 = scmp.lt.s32.totalorder %s1698_s18, %s1693_s27 }
  0x61   : > { %p1696_p8 = pnand %p1694_p13, %p1667_p1 }
  0x62   : > { %p1701_p6 = por %p1700_p4, %p1699_p2 }
  0x63   : > { %p1697_p10 = pneg %p1696_p8 }
  0x65   : > { %p1702_p12 = pnand %p1701_p6, %p1697_p10 }
  0x67   : > { %1705 = shalt.err (!%p1702_p12)
}
  0x68   : > { %s1706_s24 = scalar_lea.vmem %s359_s29, 64  ;;  %s1835_s19 = smov [#allocation6]  }
  0x69   : > { %p1707_p0 = scmp.ne.s32.totalorder %s359_s29, %s1706_s24  ;;  %s1711_s25 = sshll.u32 %s1835_s19, 4  ;;  %s1712_s25 = int_to_ptr.vmem [resolvable:$false] %s1711_s25 }
  0x6a   : > { %s1713_s26 = scalar_lea.vmem %s1712_s25, 128  ;;  %p1714_p7 = scmp.lt.s32.totalorder %s359_s29, %s1712_s25 }
  0x6b   : > { %p1709_p5 = pnand %p1707_p0, %p1667_p1  ;;  %p1715_p9 = scmp.lt.s32.totalorder %s1713_s26, %s1706_s24 }
  0x6d   : > { %p1710_p3 = pneg %p1709_p5  ;;  %p1716_p13 = por %p1715_p9, %p1714_p7 }
  0x6f   : > { %p1717_p8 = pnand %p1716_p13, %p1710_p3 }
  0x71   : > { %1720 = shalt.err (!%p1717_p8)
}
  0x72   : > { %1498 = dma.hbm_to_vmem [thread:$0]  (!%p2010_p11), %s2017_s4, 64, %s359_s29, %s348_s20  }
  0x73   : > { %p2291_p10 = scmp.ne.s32.totalorder %s2281_s17, 0 }
  0x74   : > { %s2062_s11 = sand.u32 (!%p2291_p10), 1, %s1819_s10   ;;  %p2292_p1 = scmp.ne.s32.totalorder (!%p2291_p10), %s2279_s15, 0 }
  0x75   : > { %367 = sbr.rel (%p2291_p10) target bundleno = 1519 (0x5ef), region = 52  ;;  %s1321_s22 = sshll.u32 (!%p2291_p10), %s2062_s11, 2 }
  0x76   : > { %s370_s27 = scalar_lea.sflag (!%p2291_p10), [#allocation4], %s2062_s11  ;;  %s373_s23 = scalar_lea.vmem (!%p2291_p10), [#allocation3], %s1321_s22 }
  0x7a   : > { %1790 = dma.done.wait (%p2292_p1), %s370_s27, 64  }
  0x7b   : > { %1792 = vsyncadd (%p2292_p1), %s370_s27, 4294967232  ;;  %s378_s4 = sand.u32 1, %s1923_s13   ;;  %s382_s17 = scalar_lea.vmem [#allocation6], %s1321_s22 }
  0x7c   : > { %s379_s28 = scalar_lea.sflag [#allocation7], %s378_s4 }
  0x7d   : > { %1794 = dma.done.wait (%p2292_p1), %s379_s28, 64  }
  0x7e   : > { %1796 = vsyncadd (%p2292_p1), %s379_s28, 4294967232  ;;  %p2293_p11 = scmp.eq.s32.totalorder %s1923_s13, 0 }
  0x80   : > { %1798 = dma.done.wait (%p2293_p11), [#allocation7], 256   ;;  %p2294_p2 = pmov %p2293_p11 }
  0x82   : > { %1800 = vsyncadd (%p2294_p2), [#allocation7], 4294967040  ;;  %p2295_p4 = pmov %p2294_p2 }
  0x83   : > { %p2296_p6 = pmov %p2294_p2 }
  0x84   : > { %1802 = dma.done.wait (%p2295_p4), [#allocation10], 512  }
  0x85   : > { %1804 = vsyncadd (%p2296_p6), [#allocation10], 4294966784  ;;  %v1836_v0 = vmov 0.0   ;;  %vm1837_vm0 = vmmov 0   ;;  %v1565_v1 = vld [vmem:[#allocation9 + $0x8] sm:$0xff]   ;;  %v1566_v2 = vld [vmem:[#allocation8 + $0x8] sm:$0xff]  }
  0x86   : > { %1398 = vmatprep.subr.bf16.mxu1 %v1836_v0  ;;  %1390 = vmatprep.subr.bf16.mxu0 %v1836_v0  ;;  %v1567_v3 = vld [vmem:[#allocation9] sm:$0xff]   ;;  %v1568_v4 = vld [vmem:[#allocation8] sm:$0xff]   ;;  %v441_v5 = vld [vmem:[%s382_s17] sm:$0xf]  ;;  %vm465_vm1 = vcmask 261120   ;;  %vm577_vm2 = vcmask 64512  }
  0x87   : > { %1402 = vmatprep.mubr.msk.bf16.mxu1 %vm1837_vm0, %v1836_v0  ;;  %1394 = vmatprep.mubr.msk.bf16.mxu0 %vm1837_vm0, %v1836_v0  ;;  %v440_v6 = vld [vmem:[%s373_s23] sm:$0xf]  ;;  %v1332_v7 = vld [vmem:[%s2263_s5] ss:$0 sm:$0xff]  ;;  %s1838_s18 = smov 112   ;;  %s1839_s21 = smov 120  }
  0x88   : > { %1399 = vmatpush3.bf16.msra.mxu1 %v1565_v1  ;;  %1391 = vmatpush3.bf16.msra.mxu0 %v1566_v2  ;;  %v1328_v8 = vld [vmem:[%s2261_s3] ss:$0 sm:$0xff]  ;;  %s1840_s6 = smov 104   ;;  %s1841_s24 = smov 96   ;;  %vm644_vm3 = vcmask 1043456   ;;  %vm636_vm4 = vcmask 60416  }
  0x89   : > { %1400 = vmatprep.subr.bf16.mxu1 %v1836_v0  ;;  %1392 = vmatprep.subr.bf16.mxu0 %v1836_v0  ;;  %s1842_s19 = smov 80   ;;  %s1843_s25 = smov 72   ;;  %vm810_vm5 = vcmask 126016   ;;  %vm931_vm6 = vcmask 191616   ;;  %vm1052_vm7 = vcmask 257216  }
  0x8a   : > { %s1327_s26 = sshll.u32 %s2062_s11, 4  ;;  %s1844_s22 = smov 88  }
  0x8b   : > { %s2147_s27 = scalar_lea.vmem [#allocation13], %s1327_s26  ;;  %s1845_s23 = smov 8  }
  0x8c   : > { %1401 = vmatpush3.bf16.msra.mxu1 %v1567_v3  ;;  %1393 = vmatpush3.bf16.msra.mxu0 %v1568_v4  ;;  %s1846_s4 = smov 16   ;;  %s1847_s28 = smov 24  }
  0x8d   : > { %1412 = vmatprep.subr.bf16.mxu1 %v1836_v0  ;;  %1406 = vmatprep.subr.bf16.mxu0 %v1836_v0  ;;  %s1364_s17 = sshll.u32 %s1923_s13, 8  ;;  %s1154_s15 = sshll.u32 %s2147_s27, 4  ;;  %s2181_s15 = int_to_ptr.vmem [resolvable:$true] %s1154_s15 }
  0x8e   : > { %s2179_s2 = scalar_lea.hbm %s2267_s9, %s1364_s17  ;;  %p2297_p0 = scmp.ne.s32.totalorder %s2289_s14, 0 }
  0x8f   : > { %1403 = vmatmul.mubr.msk.bf16.vlgmr.msra.gmra.mxu1 %vm465_vm1, %v441_v5  ;;  %1395 = vmatmul.mubr.msk.bf16.vlgmr.msra.gmra.mxu0 %vm465_vm1, %v440_v6 }
  0x90   : > { %1414 = vmatprep.mubr.msk.bf16.mxu1 %vm1837_vm0, %v1836_v0  ;;  %1408 = vmatprep.mubr.msk.bf16.mxu0 %vm1837_vm0, %v1836_v0 }
 0x14f   : > { %v570_v9 = vpop.f32.mrf.mxu1  ;;  %v503_v11 = vpop.f32.mrf.mxu0 }
 0x150   : > { %v571_v10 = vadd.f32 %v1332_v7, %v570_v9  ;;  %v504_v12 = vadd.f32 %v1328_v8, %v503_v11 }
 0x151   : > { %v1404_v13 = vpop.f32.mrf.mxu1  ;;  %v1396_v15 = vpop.f32.mrf.mxu0 }
 0x152   : > { %v2105_v14 = vpack.c.bf16 %v571_v10, %v571_v10  ;;  %v509_v17 = vpack.c.bf16 %v504_v12, %v504_v12 }
 0x153   : > { %v573_v16 = vpop.f32.mrf.mxu1  ;;  %v506_v18 = vpop.f32.mrf.mxu0 }
 0x154   : > { %814 = vrot.lane.b32.xlu1 %v2105_v14, %s1838_s18  ;;  %693 = vrot.lane.b32.xlu0 %v2105_v14, %s1839_s21  ;;  %v582_v19 = vsel %vm577_vm2, %v2105_v14, 0 }
 0x155   : > { %v1405_v20 = vpop.f32.mrf.mxu1  ;;  %1407 = vmatpush3.bf16.xpose.msra.mxu0 %v582_v19  ;;  %v1397_v21 = vpop.f32.mrf.mxu0 }
 0x156   : > { %1418 = vmatprep.subr.bf16.mxu0 %v1836_v0 }
 0x158   : > { %812 = vrot.lane.b32.xlu1 %v509_v17, %s1838_s18  ;;  %691 = vrot.lane.b32.xlu0 %v509_v17, %s1839_s21  ;;  %s1128_s18 = scalar_lea.sflag [#allocation14], %s2062_s11  ;;  %s1721_s21 = scalar_lea.vmem %s2181_s15, 256 }
 0x159   : > { %p1722_p12 = scmp.ne.s32.totalorder %s2181_s15, %s1721_s21 }
 0x15b   : > { %p1723_p5 = pnand %p1722_p12, %p2297_p0 }
 0x15c   : > { %933 = vrot.lane.b32.xlu1 %v509_v17, %s1840_s6  ;;  %935 = vrot.lane.b32.xlu0 %v2105_v14, %s1840_s6  ;;  %s1848_s6 = smov [#allocation13]  }
 0x15d   : > { %1409 = vmatmul.mubr.msk.bf16.vlgmr.msra.gmra.mxu0 %vm577_vm2, %v509_v17  ;;  %p1724_p3 = pneg %p1723_p5 }
 0x15e   : > { %1420 = vmatprep.mubr.msk.bf16.mxu0 %vm1837_vm0, %v1836_v0 }
 0x1c6   : > { %v694_v22 = vpop.permute.xlu0 %693  ;;  %v815_v24 = vpop.permute.xlu1 %814 }
 0x1c7   : > { %v699_v23 = vsel %vm577_vm2, %v694_v22, 0  ;;  %v820_v26 = vsel %vm577_vm2, %v815_v24, 0 }
 0x1c8   : > { %1419 = vmatpush3.bf16.xpose.msra.mxu0 %v699_v23 }
 0x1c9   : > { %1430 = vmatprep.subr.bf16.mxu0 %v1836_v0 }
 0x1ca   : > { %v692_v25 = vpop.permute.xlu0 %691  ;;  %v813_v28 = vpop.permute.xlu1 %812 }
 0x1ce   : > { %v936_v27 = vpop.permute.xlu0 %935  ;;  %v934_v30 = vpop.permute.xlu1 %933 }
 0x1cf   : > { %1421 = vmatmul.mubr.msk.bf16.vlgmr.msra.gmra.mxu0 %vm577_vm2, %v692_v25  ;;  %v941_v29 = vsel %vm577_vm2, %v936_v27, 0 }
 0x1d0   : > { %1431 = vmatpush3.bf16.xpose.msra.mxu0 %v820_v26  ;;  %1432 = vmatprep.mubr.msk.bf16.mxu0 %vm1837_vm0, %v1836_v0 }
 0x1d1   : > { %1442 = vmatprep.subr.bf16.mxu0 %v1836_v0 }
 0x1d7   : > { %1433 = vmatmul.mubr.msk.bf16.vlgmr.msra.gmra.mxu0 %vm577_vm2, %v813_v28 }
 0x1d8   : > { %1443 = vmatpush3.bf16.xpose.msra.mxu0 %v941_v29  ;;  %1444 = vmatprep.mubr.msk.bf16.mxu0 %vm1837_vm0, %v1836_v0 }
 0x1d9   : > { %1454 = vmatprep.subr.bf16.mxu0 %v1836_v0 }
 0x1df   : > { %1445 = vmatmul.mubr.msk.bf16.vlgmr.msra.gmra.mxu0 %vm577_vm2, %v934_v30 }
 0x1e0   : > { %1458 = vmatprep.mubr.msk.bf16.mxu0 %vm1837_vm0, %v1836_v0 }
 0x21d   : > { %v618_v31 = vpop.f32.mrf.mxu0 }
 0x21e   : > { %v624_v32 = vsel %vm577_vm2, %v618_v31, -inf }
 0x21f   : > { %625 = vmax.xlane.f32.xlu0 %v624_v32  ;;  %v1410_v33 = vpop.f32.mrf.mxu0 }
 0x221   : > { %v621_v34 = vpop.f32.mrf.mxu0 }
 0x223   : > { %v1411_v35 = vpop.f32.mrf.mxu0 }
 0x28f   : > { %v735_v36 = vpop.f32.mrf.mxu0 }
 0x290   : > { %v741_v37 = vsel %vm577_vm2, %v735_v36, -inf }
 0x291   : > { %742 = vmax.xlane.f32.xlu1 %v741_v37  ;;  %v1422_v38 = vpop.f32.mrf.mxu0 }
 0x293   : > { %v738_v39 = vpop.f32.mrf.mxu0 }
 0x295   : > { %v1423_v40 = vpop.f32.mrf.mxu0 }
 0x297   : > { %v856_v41 = vpop.f32.mrf.mxu0 }
 0x298   : > { %v862_v42 = vsel %vm577_vm2, %v856_v41, -inf }
 0x299   : > { %863 = vmax.xlane.f32.xlu0 %v862_v42  ;;  %v1434_v43 = vpop.f32.mrf.mxu0  ;;  %v1569_v42 = vld [vmem:[#allocation11 + $0x8] sm:$0xff]  }
 0x29a   : > { %1455 = vmatpush3.bf16.msra.mxu0 %v1569_v42 }
 0x29b   : > { %v859_v44 = vpop.f32.mrf.mxu0  ;;  %1456 = vmatprep.subr.bf16.mxu0 %v1836_v0 }
 0x29c   : > { %v1570_v44 = vld [vmem:[#allocation11] sm:$0xff]  }
 0x29d   : > { %v1435_v45 = vpop.f32.mrf.mxu0 }
 0x29e   : > { %1457 = vmatpush3.bf16.msra.mxu0 %v1570_v44 }
 0x29f   : > { %v977_v46 = vpop.f32.mrf.mxu0 }
 0x2a0   : > { %v983_v47 = vsel %vm577_vm2, %v977_v46, -inf }
 0x2a1   : > { %984 = vmax.xlane.f32.xlu0 %v983_v47  ;;  %v1446_v48 = vpop.f32.mrf.mxu0 }
 0x2a3   : > { %v980_v49 = vpop.f32.mrf.mxu0 }
 0x2a5   : > { %v1447_v50 = vpop.f32.mrf.mxu0 }
 0x2a8   : > { %v626_v51 = vpop.xlane.xlu0 %625 }
 0x2a9   : > { %v627_v52 = vsub.f32 %v618_v31, %v626_v51 }
 0x2ab   : > { %v628_v53 = vmul.f32 1.442695, %v627_v52 }
 0x2ad   : > { %1571 = vpow2.f32 %v628_v53 }
 0x2ba   : > { %v1572_v54 = vpop.eup %1571 }
 0x2bb   : > { %v630_v55 = vsel %vm577_vm2, %v1572_v54, 0.0 }
 0x2bc   : > { %631 = vadd.xlane.f32.xlu1 %v630_v55 }
 0x2cd   : > { %639 = vrot.lane.b32.xlu1 %v2105_v14, %s1841_s24  ;;  %s1725_s24 = sshll.u32 %s1848_s6, 4  ;;  %s1726_s24 = int_to_ptr.vmem [resolvable:$false] %s1725_s24 }
 0x2ce   : > { %p1728_p7 = scmp.lt.s32.totalorder %s2181_s15, %s1726_s24 }
 0x31a   : > { %v743_v56 = vpop.xlane.xlu1 %742 }
 0x31b   : > { %v744_v57 = vsub.f32 %v735_v36, %v743_v56 }
 0x31d   : > { %v745_v58 = vmul.f32 1.442695, %v744_v57 }
 0x31f   : > { %1573 = vpow2.f32 %v745_v58 }
 0x322   : > { %v864_v59 = vpop.xlane.xlu0 %863 }
 0x323   : > { %v865_v60 = vsub.f32 %v856_v41, %v864_v59 }
 0x325   : > { %v866_v61 = vmul.f32 1.442695, %v865_v60 }
 0x327   : > { %1575 = vpow2.f32 %v866_v61 }
 0x32a   : > { %v985_v62 = vpop.xlane.xlu0 %984 }
 0x32b   : > { %v986_v63 = vsub.f32 %v977_v46, %v985_v62 }
 0x32c   : > { %v1574_v1 = vpop.eup %1573 }
 0x32d   : > { %v987_v2 = vmul.f32 1.442695, %v986_v63  ;;  %v747_v3 = vsel %vm577_vm2, %v1574_v1, 0.0 }
 0x32e   : > { %748 = vadd.xlane.f32.xlu0 %v747_v3 }
 0x32f   : > { %1577 = vpow2.f32 %v987_v2 }
 0x334   : > { %v1576_v4 = vpop.eup %1575 }
 0x335   : > { %v868_v5 = vsel %vm577_vm2, %v1576_v4, 0.0 }
 0x336   : > { %869 = vadd.xlane.f32.xlu1 %v868_v5 }
 0x33c   : > { %v1578_v6 = vpop.eup %1577 }
 0x33d   : > { %v989_v7 = vsel %vm577_vm2, %v1578_v6, 0.0 }
 0x33e   : > { %990 = vadd.xlane.f32.xlu0 %v989_v7 }
 0x345   : > { %v632_v8 = vpop.xlane.xlu1 %631 }
 0x346   : > { %1579 = vrcp.f32 %v632_v8 }
 0x347   : > { %876 = vrot.lane.b32.xlu1 %v2105_v14, %s1842_s19  ;;  %s1727_s19 = scalar_lea.vmem %s1726_s24, 512 }
 0x348   : > { %p1729_p9 = scmp.lt.s32.totalorder %s1727_s19, %s1721_s21 }
 0x349   : > { %v640_v9 = vpop.permute.xlu1 %639 }
 0x34a   : > { %v646_v10 = vsel %vm644_vm3, %v640_v9, 0  ;;  %p1730_p13 = por %p1729_p9, %p1728_p7 }
 0x34b   : > { %1413 = vmatpush3.bf16.msra.mxu1 %v646_v10  ;;  %997 = vrot.lane.b32.xlu1 %v2105_v14, %s1843_s25 }
 0x34c   : > { %1424 = vmatprep.subr.bf16.mxu1 %v1836_v0  ;;  %p1731_p8 = pnand %p1730_p13, %p1724_p3 }
 0x353   : > { %v1580_v11 = vpop.eup %1579 }
 0x354   : > { %755 = vrot.lane.b32.xlu0 %v2105_v14, %s1844_s22  ;;  %v634_v12 = vmul.f32 %v1580_v11, %v1572_v54 }
 0x356   : > { %v635_v13 = vpack.c.bf16 %v634_v12, %v634_v12 }
 0x358   : > { %1415 = vmatmul.mubr.msk.bf16.vlgmr.msra.gmra.mxu1 %vm577_vm2, %v635_v13  ;;  %637 = vst.msk [vmem:[%s2147_s27] sm:$0xf] %vm636_vm4, %v635_v13 }
 0x359   : > { %1426 = vmatprep.mubr.msk.bf16.mxu1 %vm1837_vm0, %v1836_v0 }
 0x3b7   : > { %v749_v15 = vpop.xlane.xlu0 %748 }
 0x3b8   : > { %1581 = vrcp.f32 %v749_v15 }
 0x3bf   : > { %v870_v16 = vpop.xlane.xlu1 %869 }
 0x3c0   : > { %1583 = vrcp.f32 %v870_v16 }
 0x3c3   : > { %v877_v23 = vpop.permute.xlu1 %876 }
 0x3c4   : > { %v882_v25 = vsel %vm644_vm3, %v877_v23, 0 }
 0x3c5   : > { %v1582_v17 = vpop.eup %1581 }
 0x3c6   : > { %v751_v14 = vmul.f32 %v1582_v17, %v1574_v1 }
 0x3c7   : > { %v991_v18 = vpop.xlane.xlu0 %990  ;;  %v998_v28 = vpop.permute.xlu1 %997 }
 0x3c8   : > { %1585 = vrcp.f32 %v991_v18  ;;  %v752_v19 = vpack.c.bf16 %v751_v14, %v751_v14  ;;  %v1003_v30 = vsel %vm644_vm3, %v998_v28, 0 }
 0x3ca   : > { %1339 = vst.msk [vmem:[%s2147_s27 + $0x4] sm:$0xf] %vm636_vm4, %v752_v19 }
 0x3cb   : > { %v756_v20 = vpop.permute.xlu0 %755 }
 0x3cc   : > { %v761_v21 = vsel %vm644_vm3, %v756_v20, 0 }
 0x3cd   : > { %v1584_v22 = vpop.eup %1583  ;;  %1425 = vmatpush3.bf16.msra.mxu1 %v761_v21 }
 0x3ce   : > { %1436 = vmatprep.subr.bf16.mxu1 %v1836_v0  ;;  %v872_v24 = vmul.f32 %v1584_v22, %v1576_v4 }
 0x3d0   : > { %1427 = vmatmul.mubr.msk.bf16.vlgmr.msra.gmra.mxu1 %vm577_vm2, %v752_v19  ;;  %v873_v26 = vpack.c.bf16 %v872_v24, %v872_v24 }
 0x3d1   : > { %1437 = vmatpush3.bf16.msra.mxu1 %v882_v25  ;;  %1438 = vmatprep.mubr.msk.bf16.mxu1 %vm1837_vm0, %v1836_v0 }
 0x3d2   : > { %1448 = vmatprep.subr.bf16.mxu1 %v1836_v0  ;;  %1343 = vst.msk [vmem:[%s2147_s27 + $0x8] sm:$0xf] %vm636_vm4, %v873_v26 }
 0x3d5   : > { %v1586_v27 = vpop.eup %1585 }
 0x3d6   : > { %v993_v29 = vmul.f32 %v1586_v27, %v1578_v6 }
 0x3d8   : > { %1439 = vmatmul.mubr.msk.bf16.vlgmr.msra.gmra.mxu1 %vm577_vm2, %v873_v26  ;;  %v994_v31 = vpack.c.bf16 %v993_v29, %v993_v29 }
 0x3d9   : > { %1449 = vmatpush3.bf16.msra.mxu1 %v1003_v30  ;;  %1450 = vmatprep.mubr.msk.bf16.mxu1 %vm1837_vm0, %v1836_v0 }
 0x3da   : > { %1347 = vst.msk [vmem:[%s2147_s27 + $0xc] sm:$0xf] %vm636_vm4, %v994_v31 }
 0x3e0   : > { %1451 = vmatmul.mubr.msk.bf16.vlgmr.msra.gmra.mxu1 %vm577_vm2, %v994_v31 }
 0x418   : > { %v682_v32 = vpop.f32.mrf.mxu1 }
 0x419   : > { %v688_v33 = vpack.c.bf16 %v682_v32, %v682_v32 }
 0x41a   : > { %v1416_v34 = vpop.f32.mrf.mxu1 }
 0x41b   : > { %689 = vst.msk [vmem:[#allocation2] sm:$0xf] %vm636_vm4, %v688_v33 }
 0x41c   : > { %v685_v35 = vpop.f32.mrf.mxu1 }
 0x41e   : > { %v1417_v36 = vpop.f32.mrf.mxu1 }
 0x490   : > { %v797_v37 = vpop.f32.mrf.mxu1 }
 0x491   : > { %v1361_v38 = vpack.c.bf16 %v797_v37, %v797_v37 }
 0x492   : > { %v1428_v39 = vpop.f32.mrf.mxu1 }
 0x493   : > { %807 = vrot.lane.b32.xlu0 %v1361_v38, %s1845_s23 }
 0x494   : > { %v800_v40 = vpop.f32.mrf.mxu1 }
 0x496   : > { %v1429_v41 = vpop.f32.mrf.mxu1 }
 0x498   : > { %v918_v43 = vpop.f32.mrf.mxu1 }
 0x499   : > { %v1362_v45 = vpack.c.bf16 %v918_v43, %v918_v43 }
 0x49a   : > { %v1440_v46 = vpop.f32.mrf.mxu1 }
 0x49b   : > { %928 = vrot.lane.b32.xlu1 %v1362_v45, %s1846_s4 }
 0x49c   : > { %v921_v47 = vpop.f32.mrf.mxu1 }
 0x49e   : > { %v1441_v48 = vpop.f32.mrf.mxu1 }
 0x4a0   : > { %v1039_v49 = vpop.f32.mrf.mxu1 }
 0x4a1   : > { %v1363_v50 = vpack.c.bf16 %v1039_v49, %v1039_v49 }
 0x4a2   : > { %v1452_v51 = vpop.f32.mrf.mxu1 }
 0x4a3   : > { %1049 = vrot.lane.b32.xlu0 %v1363_v50, %s1847_s28 }
 0x4a4   : > { %v1042_v52 = vpop.f32.mrf.mxu1 }
 0x4a6   : > { %v1453_v53 = vpop.f32.mrf.mxu1 }
 0x505   : > { %v808_v54 = vpop.permute.xlu0 %807 }
 0x506   : > { %811 = vst.msk [vmem:[#allocation2] sm:$0xf] %vm810_vm5, %v808_v54 }
 0x50d   : > { %v929_v0 = vpop.permute.xlu1 %928 }
 0x50e   : > { %932 = vst.msk [vmem:[#allocation2] sm:$0xf] %vm931_vm6, %v929_v0 }
 0x515   : > { %v1050_v55 = vpop.permute.xlu0 %1049 }
 0x516   : > { %1053 = vst.msk [vmem:[#allocation2] sm:$0xf] %vm1052_vm7, %v1050_v55 }
 0x51d   : > { %v1054_v56 = vld [vmem:[#allocation2] sm:$0xf] }
 0x51e   : > { %1459 = vmatmul.mubr.msk.bf16.vlgmr.msra.gmra.mxu0 %vm465_vm1, %v1054_v56 }
 0x51f   : > { %1734 = shalt.err (!%p1731_p8)
}
 0x520   : > { %s1735_s25 = scalar_lea.hbm %s2179_s2, 256  ;;  %s1739_s27 = scalar_lea.hbm %s2267_s9, 512 }
 0x521   : > { %p1736_p10 = scmp.ne.s32.totalorder %s2179_s2, %s1735_s25  ;;  %p1740_p2 = scmp.lt.s32.totalorder %s2179_s2, %s2267_s9 }
 0x522   : > { %p1741_p4 = scmp.lt.s32.totalorder %s1739_s27, %s1735_s25 }
 0x523   : > { %p1737_p1 = pnand %p1736_p10, %p2297_p0 }
 0x524   : > { %p1742_p6 = por %p1741_p4, %p1740_p2 }
 0x525   : > { %p1738_p11 = pneg %p1737_p1 }
 0x527   : > { %p1743_p12 = pnand %p1742_p6, %p1738_p11 }
 0x529   : > { %1746 = shalt.err (!%p1743_p12)
}
 0x52a   : > { %s1849_s28 = smov 64   ;;  %s1850_s17 = smov 4   ;;  %v1350_v57 = vld [vmem:[%s2265_s7] ss:$0 sm:$0xff] }
 0x52b   : > { %1479 = dma.vmem_to_hbm [thread:$0]  (%p2297_p0), %s2181_s15, 256, %s2179_s2, %s1128_s18, %s1849_s28, %s1849_s28, %s1850_s17  }
 0x52c   : > { %s1326_s29 = sshll.u32 %s2062_s11, 3  ;;  %s1356_s6 = sshll.u32 %s1923_s13, 7 }
 0x52d   : > { %s431_s24 = scalar_lea.vmem [#allocation12], %s1326_s29  ;;  %s2214_s22 = scalar_lea.hbm %s2266_s8, %s1356_s6 }
 0x52e   : > { %s1141_s19 = sshll.u32 %s431_s24, 4  ;;  %s1123_s15 = scalar_lea.sflag [#allocation5], %s2062_s11  ;;  %s2216_s19 = int_to_ptr.vmem [resolvable:$true] %s1141_s19 }
 0x52f   : > { %s1747_s13 = scalar_lea.vmem %s2216_s19, 128  ;;  %s1851_s2 = smov [#allocation12]  }
 0x530   : > { %p1748_p5 = scmp.ne.s32.totalorder %s2216_s19, %s1747_s13  ;;  %s1751_s18 = sshll.u32 %s1851_s2, 4  ;;  %s1752_s18 = int_to_ptr.vmem [resolvable:$false] %s1751_s18 }
 0x531   : > { %s1753_s27 = scalar_lea.vmem %s1752_s18, 256  ;;  %p1754_p9 = scmp.lt.s32.totalorder %s2216_s19, %s1752_s18 }
 0x532   : > { %p1749_p3 = pnand %p1748_p5, %p2297_p0  ;;  %p1755_p13 = scmp.lt.s32.totalorder %s1753_s27, %s1747_s13 }
 0x534   : > { %p1750_p7 = pneg %p1749_p3  ;;  %p1756_p8 = por %p1755_p13, %p1754_p9 }
 0x536   : > { %p1757_p10 = pnand %p1756_p8, %p1750_p7 }
 0x5de   : > { %v1115_v58 = vpop.f32.mrf.mxu0 }
 0x5df   : > { %v1116_v59 = vadd.f32 %v1350_v57, %v1115_v58 }
 0x5e0   : > { %v1460_v60 = vpop.f32.mrf.mxu0 }
 0x5e1   : > { %1121 = vst.msk [vmem:[%s431_s24] sm:$0xff] %vm465_vm1, %v1116_v59 }
 0x5e2   : > { %v1118_v61 = vpop.f32.mrf.mxu0 }
 0x5e3   : > { %1760 = shalt.err (!%p1757_p10)
}
 0x5e4   : > { %s1761_s23 = scalar_lea.hbm %s2214_s22, 128  ;;  %s1765_s28 = scalar_lea.hbm %s2266_s8, 256 }
 0x5e5   : > { %p1762_p1 = scmp.ne.s32.totalorder %s2214_s22, %s1761_s23  ;;  %p1766_p4 = scmp.lt.s32.totalorder %s2214_s22, %s2266_s8 }
 0x5e6   : > { %p1767_p6 = scmp.lt.s32.totalorder %s1765_s28, %s1761_s23 }
 0x5e7   : > { %p1763_p11 = pnand %p1762_p1, %p2297_p0 }
 0x5e8   : > { %p1768_p12 = por %p1767_p6, %p1766_p4 }
 0x5e9   : > { %p1764_p2 = pneg %p1763_p11 }
 0x5eb   : > { %p1769_p5 = pnand %p1768_p12, %p1764_p2 }
 0x5ed   : > { %1772 = shalt.err (!%p1769_p5)
}
 0x5ee   : > { %1478 = dma.vmem_to_hbm [thread:$0]  (%p2297_p0), %s2216_s19, 128, %s2214_s22, %s1123_s15   ;;  %v1461_v62 = vpop.f32.mrf.mxu0 }
 0x5ef PF: > { %s1169_s20 = sand.u32 1, %s1815_s30   ;;  %p2298_p3 = scmp.ne.s32.totalorder %s2280_s16, 0 }
 0x5f0   : > { %p2299_p7 = scmp.ge.s32.totalorder %s1827_s12, 2  ;;  %s1170_s21 = scalar_lea.sflag [#allocation5], %s1169_s20 }
 0x5f2   : > { %p1500_p9 = pnand %p2299_p7, %p2298_p3 }
 0x5f4   : > { %p1501_p13 = pneg %p1500_p9 }
 0x5f6   : > { %1806 = dma.done.wait (%p1501_p13), %s1170_s21, 128  }
 0x5f7   : > { %1808 = vsyncadd (%p1501_p13), %s1170_s21, 4294967168  ;;  %s1179_s6 = scalar_lea.sflag [#allocation14], %s1169_s20 }
 0x5f8   : > { %1810 = dma.done.wait (%p1501_p13), %s1179_s6, 256  }
 0x5f9   : > { %1812 = vsyncadd (%p1501_p13), %s1179_s6, 4294967040  ;;  %s2300_s12 = sld [smem:[#allocation22_spill]]  ;;  %s2303_s30 = smov %s1819_s10 }
 0x5fa   : > { %s2301_s14 = sld [smem:[#allocation21_spill]] }
 0x5fb   : > { %s2302_s11 = sld [smem:[#allocation23_spill]] }
 0x5ff   : > { %p30_p0 = scmp.ge.s32.totalorder %s2300_s12, 4  }
 0x600   : > { %s2304_s10 = smov %s2301_s14 }
 0x601   :  { %32 = sbr.rel (!%p30_p0) target bundleno = 14 (0xe), region = 142 }
 0x606   :  { %1184 = vsyncpa [#allocation4], 1 }
 0x607   :  { %1186 = vsyncpa [#allocation4 + $0x1], 1 }
 0x608   :  { %1187 = vsyncpa [#allocation7], 1 }
 0x609   :  { %1189 = vsyncpa [#allocation7 + $0x1], 1 }
 0x60a   :  { %1190 = vsyncpa [#allocation10], 1 }
 0x60b   :  { %1191 = vsyncpa [#allocation5], 1 }
 0x60c   :  { %1193 = vsyncpa [#allocation5 + $0x1], 1 }
 0x60d   :  { %1194 = vsyncpa [#allocation14], 1 }
 0x60e   :  { %1196 = vsyncpa [#allocation14 + $0x1], 1 }

</bundles_post_ra>
